<compile_context>
chip_gen: v7x
topology: tpu7x:2x2x1
jax: 0.10.0
libtpu: 0.0.40
codegen_flags: <defaults>
</compile_context>

<pallas_src>
import functools

import jax
import jax.numpy as jnp
from jax.experimental import pallas as pl
from jax.experimental.pallas import tpu as pltpu


def _round_up(x, m):
    return ((x + m - 1) // m) * m


def _pad2d(a, rows, cols):
    pr, pc = rows - a.shape[0], cols - a.shape[1]
    if pr or pc:
        a = jnp.pad(a, ((0, pr), (0, pc)))
    return a


def _pick_tile(dim, candidates):
    for c in candidates:
        if dim % c == 0:
            return c
    return dim


# ---------------------------------------------------------------------------
# Kernels
# ---------------------------------------------------------------------------
def _mm_single_kernel(a_ref, b_ref, o_ref):
    """o = a @ b   (whole K in one tile; direct write, no scratch)."""
    o_ref[...] = jnp.dot(
        a_ref[...], b_ref[...], preferred_element_type=jnp.float32
    ).astype(o_ref.dtype)


def _mm_bias_single_kernel(a_ref, b_ref, bias_ref, o_ref):
    """o = a @ b + bias   (whole K in one tile)."""
    acc = jnp.dot(a_ref[...], b_ref[...], preferred_element_type=jnp.float32)
    o_ref[...] = (acc + bias_ref[...]).astype(o_ref.dtype)


def _mm_ktiled_kernel(a_ref, b_ref, o_ref, acc_ref):
    """o = a @ b, K-tiled with a persistent f32 accumulator (P3)."""
    k = pl.program_id(2)

    @pl.when(k == 0)
    def _():
        acc_ref[...] = jnp.zeros_like(acc_ref)

    acc_ref[...] += jnp.dot(
        a_ref[...], b_ref[...], preferred_element_type=jnp.float32
    )

    @pl.when(k == pl.num_programs(2) - 1)
    def _():
        o_ref[...] = acc_ref[...].astype(o_ref.dtype)


def _mm_bias_ktiled_kernel(a_ref, b_ref, bias_ref, o_ref, acc_ref):
    """o = a @ b + bias, K-tiled with a persistent f32 accumulator (P3)."""
    k = pl.program_id(2)

    @pl.when(k == 0)
    def _():
        acc_ref[...] = jnp.zeros_like(acc_ref)

    acc_ref[...] += jnp.dot(
        a_ref[...], b_ref[...], preferred_element_type=jnp.float32
    )

    @pl.when(k == pl.num_programs(2) - 1)
    def _():
        o_ref[...] = (acc_ref[...] + bias_ref[...]).astype(o_ref.dtype)


# ---------------------------------------------------------------------------
# Tiled matmul wrapper
# ---------------------------------------------------------------------------
def _tiled_matmul(a, b, bias2d=None, *, tm=None, tn=None, tk_max=512):
    """a: (M, K), b: (K, N), bias2d: (1, N) or None. Dims multiples of 128."""
    M, K = a.shape
    K2, N = b.shape
    assert K == K2
    has_bias = bias2d is not None
    if has_bias:
        assert bias2d.shape == (1, N)

    tm = tm or _pick_tile(M, (256, 128, 8))
    tn = tn or _pick_tile(N, (256, 128))
    tk = _pick_tile(K, (tk_max, 256, 128))
    k_tiled = (K // tk) > 1

    bytes_accessed = 4 * (M * K + K * N + M * N + (N if has_bias else 0))
    cost = pl.CostEstimate(
        flops=2 * M * N * K, transcendentals=0, bytes_accessed=bytes_accessed
    )

    if not k_tiled:
        # 2-D grid, whole K per tile, write output directly (no scratch).
        grid = (M // tm, N // tn)
        in_specs = [
            pl.BlockSpec((tm, K), lambda i, j: (i, 0)),
            pl.BlockSpec((K, tn), lambda i, j: (0, j)),
        ]
        if has_bias:
            in_specs.append(pl.BlockSpec((1, tn), lambda i, j: (0, j)))
        grid_spec = pltpu.PrefetchScalarGridSpec(
            num_scalar_prefetch=0,
            grid=grid,
            in_specs=in_specs,
            out_specs=pl.BlockSpec((tm, tn), lambda i, j: (i, j)),
        )
        kernel = _mm_bias_single_kernel if has_bias else _mm_single_kernel
        dims = ("parallel", "parallel")
    else:
        # 3-D grid with K reduction last, f32 VMEM accumulator.
        grid = (M // tm, N // tn, K // tk)
        in_specs = [
            pl.BlockSpec((tm, tk), lambda i, j, k: (i, k)),
            pl.BlockSpec((tk, tn), lambda i, j, k: (k, j)),
        ]
        if has_bias:
            in_specs.append(pl.BlockSpec((1, tn), lambda i, j, k: (0, j)))
        grid_spec = pltpu.PrefetchScalarGridSpec(
            num_scalar_prefetch=0,
            grid=grid,
            in_specs=in_specs,
            out_specs=pl.BlockSpec((tm, tn), lambda i, j, k: (i, j)),
            scratch_shapes=[pltpu.VMEM((tm, tn), jnp.float32)],
        )
        kernel = _mm_bias_ktiled_kernel if has_bias else _mm_ktiled_kernel
        dims = ("parallel", "parallel", "arbitrary")

    args = (a, b, bias2d) if has_bias else (a, b)
    return pl.pallas_call(
        kernel,
        out_shape=jax.ShapeDtypeStruct((M, N), jnp.float32),
        grid_spec=grid_spec,
        compiler_params=pltpu.CompilerParams(dimension_semantics=dims),
        cost_estimate=cost,
    )(*args)


# ---------------------------------------------------------------------------
# GCN layer forward
# ---------------------------------------------------------------------------
@functools.partial(jax.jit, static_argnames=())
def gcn_layer(x, adj, weight, bias=None):
    """GCNLayer.forward: adj @ (x @ weight + bias)."""
    N, f_in = x.shape
    f_out = weight.shape[1]
    assert adj.shape == (N, N)

    # Lane-dense padding (multiples of 128) for every matrix dimension.
    n_pad = _round_up(N, 128)
    fin_pad = _round_up(f_in, 128)
    fout_pad = _round_up(f_out, 128)

    x_p = _pad2d(x.astype(jnp.float32), n_pad, fin_pad)
    w_p = _pad2d(weight.astype(jnp.float32), fin_pad, fout_pad)
    adj_p = _pad2d(adj.astype(jnp.float32), n_pad, n_pad)
    b_p = None
    if bias is not None:
        b_p = _pad2d(bias.reshape(1, f_out).astype(jnp.float32), 1, fout_pad)

    # Projection (hoisted, pipelined like any matmul), then aggregation
    # (bias-free kernel variant: no zero-bias DMA/add per output tile).
    support_p = _tiled_matmul(x_p, w_p, b_p)          # (n_pad, fout_pad)
    out_p = _tiled_matmul(adj_p, support_p, None)     # (n_pad, fout_pad)

    # Padded adj rows are zero -> padded output rows are zero; padded W/bias
    # columns are zero -> padded output columns are zero. Slice them off.
    return out_p[:N, :f_out]


def init_params(key, in_features, out_features):
    # Xavier-uniform weight, zero bias (matches nn.init.xavier_uniform_/zeros_).
    bound = (6.0 / (in_features + out_features)) ** 0.5
    weight = jax.random.uniform(
        key, (in_features, out_features), jnp.float32, minval=-bound, maxval=bound
    )
    bias = jnp.zeros((out_features,), jnp.float32)
    return weight, bias


def _make_graph(key, n):
    kadj, = jax.random.split(key, 1)
    adj_mask = (jax.random.uniform(kadj, (n, n)) < 0.1).astype(jnp.float32)
    adj = adj_mask + jnp.eye(n, dtype=jnp.float32)
    return adj / jnp.sum(adj, axis=1, keepdims=True)


if __name__ == "__main__":
    key = jax.random.PRNGKey(0)
    k1, k2, k3, k4 = jax.random.split(key, 4)

    # Test 1: small graph, with bias (single-K fast path in both matmuls).
    N, F_IN, F_OUT = 64, 32, 16
    x = jax.random.normal(k1, (N, F_IN), jnp.float32)
    adj = _make_graph(k2, N)
    weight, bias = init_params(k3, F_IN, F_OUT)

    out = jax.block_until_ready(gcn_layer(x, adj, weight, bias))
    ref = adj @ (x @ weight + bias)
    assert out.shape == (N, F_OUT)
    assert jnp.allclose(out, ref, atol=1e-4, rtol=1e-4)

    # Test 2: larger graph, no bias (exercises the K-tiled accumulator path
    # in the aggregation, since padded N = 384 > 128-wide single-K tile limit
    # is still single... K=384 splits into tk=128 x 3).
    N2, F_IN2, F_OUT2 = 320, 48, 24
    x2 = jax.random.normal(k4, (N2, F_IN2), jnp.float32)
    adj2 = _make_graph(k2, N2)
    weight2, _ = init_params(k3, F_IN2, F_OUT2)

    out2 = jax.block_until_ready(gcn_layer(x2, adj2, weight2, None))
    ref2 = adj2 @ (x2 @ weight2)
    assert out2.shape == (N2, F_OUT2)
    assert jnp.allclose(out2, ref2, atol=1e-4, rtol=1e-4)

    print("KERNEL_OK")
</pallas_src>

<mosaic_0001>
module attributes {stable_mosaic.version = 11 : i64} {
  func.func @_mm_single_kernel(%arg0: i32, %arg1: i32, %arg2: memref<128x128xf32, #tpu.memory_space<vmem>>, %arg3: memref<128x128xf32, #tpu.memory_space<vmem>>, %arg4: memref<128x128xf32, #tpu.memory_space<vmem>>) attributes {dimension_semantics = [#tpu.dimension_semantics<parallel>, #tpu.dimension_semantics<parallel>], iteration_bounds = array<i64: 1, 1>, scalar_prefetch = 0 : i64, scratch_operands = 0 : i64, tpu.core_type = #tpu.core_type<tc>, window_params = [{transform_indices = @transform_0, window_bounds = array<i64: 128, 128>}, {transform_indices = @transform_1, window_bounds = array<i64: 128, 128>}, {transform_indices = @transform_2, window_bounds = array<i64: 128, 128>}]} {
    %c0 = arith.constant 0 : index
    %c0_0 = arith.constant 0 : index
    %0 = vector.load %arg2[%c0, %c0_0] : memref<128x128xf32, #tpu.memory_space<vmem>>, vector<128x128xf32>
    %c0_1 = arith.constant 0 : index
    %c0_2 = arith.constant 0 : index
    %1 = vector.load %arg3[%c0_1, %c0_2] : memref<128x128xf32, #tpu.memory_space<vmem>>, vector<128x128xf32>
    %cst = arith.constant dense<0.000000e+00> : vector<128x128xf32>
    %2 = tpu.matmul %0, %1, %cst {dimension_numbers = #tpu.dot_dimension_numbers<[1], [0], [0], [1], [0, 0, 1, 1], [], []>} : vector<128x128xf32>, vector<128x128xf32>, vector<128x128xf32> -> vector<128x128xf32>
    %c0_3 = arith.constant 0 : index
    %c0_4 = arith.constant 0 : index
    %3 = vector.load %arg4[%c0_3, %c0_4] : memref<128x128xf32, #tpu.memory_space<vmem>>, vector<128x128xf32>
    tpu.vector_store %arg4[%c0_3, %c0_4], %2 {strides = array<i32>} : memref<128x128xf32, #tpu.memory_space<vmem>>, vector<128x128xf32>,
    return
  }
  func.func @transform_0(%arg0: i32, %arg1: i32) -> (i32, i32) {
    %c0_i32 = arith.constant 0 : i32
    %c0_i32_0 = arith.constant 0 : i32
    return %arg0, %c0_i32 : i32, i32
  }
  func.func @transform_1(%arg0: i32, %arg1: i32) -> (i32, i32) {
    %c0_i32 = arith.constant 0 : i32
    %c0_i32_0 = arith.constant 0 : i32
    return %c0_i32, %arg1 : i32, i32
  }
  func.func @transform_2(%arg0: i32, %arg1: i32) -> (i32, i32) {
    %c0_i32 = arith.constant 0 : i32
    return %arg0, %arg1 : i32, i32
  }
}

module attributes {stable_mosaic.version = 11 : i64} {
  func.func @_mm_bias_single_kernel(%arg0: i32, %arg1: i32, %arg2: memref<128x128xf32, #tpu.memory_space<vmem>>, %arg3: memref<128x128xf32, #tpu.memory_space<vmem>>, %arg4: memref<1x128xf32, #tpu.memory_space<vmem>>, %arg5: memref<128x128xf32, #tpu.memory_space<vmem>>) attributes {dimension_semantics = [#tpu.dimension_semantics<parallel>, #tpu.dimension_semantics<parallel>], iteration_bounds = array<i64: 1, 1>, scalar_prefetch = 0 : i64, scratch_operands = 0 : i64, tpu.core_type = #tpu.core_type<tc>, window_params = [{transform_indices = @transform_0, window_bounds = array<i64: 128, 128>}, {transform_indices = @transform_1, window_bounds = array<i64: 128, 128>}, {transform_indices = @transform_2, window_bounds = array<i64: 1, 128>}, {transform_indices = @transform_3, window_bounds = array<i64: 128, 128>}]} {
    %c0 = arith.constant 0 : index
    %c0_0 = arith.constant 0 : index
    %0 = vector.load %arg2[%c0, %c0_0] : memref<128x128xf32, #tpu.memory_space<vmem>>, vector<128x128xf32>
    %c0_1 = arith.constant 0 : index
    %c0_2 = arith.constant 0 : index
    %1 = vector.load %arg3[%c0_1, %c0_2] : memref<128x128xf32, #tpu.memory_space<vmem>>, vector<128x128xf32>
    %cst = arith.constant dense<0.000000e+00> : vector<128x128xf32>
    %2 = tpu.matmul %0, %1, %cst {dimension_numbers = #tpu.dot_dimension_numbers<[1], [0], [0], [1], [0, 0, 1, 1], [], []>} : vector<128x128xf32>, vector<128x128xf32>, vector<128x128xf32> -> vector<128x128xf32>
    %c0_3 = arith.constant 0 : index
    %c0_4 = arith.constant 0 : index
    %3 = vector.load %arg4[%c0_3, %c0_4] : memref<1x128xf32, #tpu.memory_space<vmem>>, vector<1x128xf32>
    %4 = vector.broadcast %3 : vector<1x128xf32> to vector<128x128xf32>
    %5 = arith.addf %2, %4 : vector<128x128xf32>
    %c0_5 = arith.constant 0 : index
    %c0_6 = arith.constant 0 : index
    %6 = vector.load %arg5[%c0_5, %c0_6] : memref<128x128xf32, #tpu.memory_space<vmem>>, vector<128x128xf32>
    tpu.vector_store %arg5[%c0_5, %c0_6], %5 {strides = array<i32>} : memref<128x128xf32, #tpu.memory_space<vmem>>, vector<128x128xf32>,
    return
  }
  func.func @transform_0(%arg0: i32, %arg1: i32) -> (i32, i32) {
    %c0_i32 = arith.constant 0 : i32
    %c0_i32_0 = arith.constant 0 : i32
    return %arg0, %c0_i32 : i32, i32
  }
  func.func @transform_1(%arg0: i32, %arg1: i32) -> (i32, i32) {
    %c0_i32 = arith.constant 0 : i32
    %c0_i32_0 = arith.constant 0 : i32
    return %c0_i32, %arg1 : i32, i32
  }
  func.func @transform_2(%arg0: i32, %arg1: i32) -> (i32, i32) {
    %c0_i32 = arith.constant 0 : i32
    %c0_i32_0 = arith.constant 0 : i32
    return %c0_i32, %arg1 : i32, i32
  }
  func.func @transform_3(%arg0: i32, %arg1: i32) -> (i32, i32) {
    %c0_i32 = arith.constant 0 : i32
    return %arg0, %arg1 : i32, i32
  }
}

</mosaic_0001>

<bundles_post_ra>
// kernel: gcn_layer.3
= control target key start
LH: loop header
LB: loop body
LE: loop exit
PB: predicated region body
PF: predicated region fallthrough
CT: control target
= control target key end

     0   :  { %s503_s1 = inlined_call_operand.vmem [shape: f32[128,128], index: 1, kind: input, shape index: {}]   ;;  %s504_s0 = inlined_call_operand.vmem [shape: f32[128,128], index: 0, kind: input, shape index: {}]   ;;  %s505_s2 = inlined_call_operand.vmem [shape: f32[128,128], index: 2, kind: output, shape index: {}]  }
   0x1   :  { %v27_v0 = vld [vmem:[%s503_s1] sm:$0xff]  ;;  %v28_v1 = vld [vmem:[%s503_s1 + $0x8] sm:$0xff]  ;;  %v29_v2 = vld [vmem:[%s503_s1 + $0x10] sm:$0xff] }
   0x2   :  { %v296_v3 = vpack.c.bf16 %v28_v1, %v27_v0  ;;  %v30_v4 = vld [vmem:[%s503_s1 + $0x18] sm:$0xff]  ;;  %v31_v6 = vld [vmem:[%s503_s1 + $0x20] sm:$0xff]  ;;  %v32_v7 = vld [vmem:[%s503_s1 + $0x28] sm:$0xff] }
   0x3   :  { %v300_v5 = vpack.c.bf16 %v30_v4, %v29_v2  ;;  %v304_v8 = vpack.c.bf16 %v32_v7, %v31_v6  ;;  %v11_v9 = vld [vmem:[%s504_s0] sm:$0xff]  ;;  %v33_v11 = vld [vmem:[%s503_s1 + $0x30] sm:$0xff]  ;;  %v34_v12 = vld [vmem:[%s503_s1 + $0x38] sm:$0xff] }
   0x4   :  { %297 = vmatprep.subr.bf16.mxu0 %v296_v3  ;;  %328 = vmatprep.subr.bf16.mxu1 %v296_v3  ;;  %v19_v10 = vld [vmem:[%s504_s0 + $0x40] sm:$0xff]  ;;  %v308_v13 = vpack.c.bf16 %v34_v12, %v33_v11  ;;  %v36_v15 = vld [vmem:[%s503_s1 + $0x48] sm:$0xff]  ;;  %v37_v17 = vld [vmem:[%s503_s1 + $0x50] sm:$0xff] }
   0x5   :  { %299 = vmatpush3.bf16.msra.mxu0 %v296_v3  ;;  %336 = vmatpush3.bf16.msra.mxu1 %v296_v3  ;;  %v35_v14 = vld [vmem:[%s503_s1 + $0x40] sm:$0xff]  ;;  %v38_v18 = vld [vmem:[%s503_s1 + $0x58] sm:$0xff]  ;;  %v40_v21 = vld [vmem:[%s503_s1 + $0x68] sm:$0xff] }
   0x6   :  { %301 = vmatprep.subr.bf16.mxu0 %v300_v5  ;;  %329 = vmatprep.subr.bf16.mxu1 %v300_v5  ;;  %v312_v16 = vpack.c.bf16 %v36_v15, %v35_v14  ;;  %v316_v19 = vpack.c.bf16 %v38_v18, %v37_v17  ;;  %v39_v20 = vld [vmem:[%s503_s1 + $0x60] sm:$0xff]  ;;  %v41_v23 = vld [vmem:[%s503_s1 + $0x70] sm:$0xff]  ;;  %v42_v24 = vld [vmem:[%s503_s1 + $0x78] sm:$0xff] }
   0x7   :  { %272 = vmatprep.mubr.f32.mxu0 %v11_v9  ;;  %284 = vmatprep.mubr.f32.mxu1 %v19_v10  ;;  %v320_v22 = vpack.c.bf16 %v40_v21, %v39_v20  ;;  %v324_v25 = vpack.c.bf16 %v42_v24, %v41_v23  ;;  %v12_v26 = vld [vmem:[%s504_s0 + $0x8] sm:$0xff]  ;;  %v13_v28 = vld [vmem:[%s504_s0 + $0x10] sm:$0xff]  ;;  %v14_v30 = vld [vmem:[%s504_s0 + $0x18] sm:$0xff] }
   0x8   :  { %v20_v27 = vld [vmem:[%s504_s0 + $0x48] sm:$0xff]  ;;  %v21_v29 = vld [vmem:[%s504_s0 + $0x50] sm:$0xff]  ;;  %v22_v31 = vld [vmem:[%s504_s0 + $0x58] sm:$0xff] }
   0x9   :  { %303 = vmatpush3.bf16.msra.mxu0 %v300_v5  ;;  %337 = vmatpush3.bf16.msra.mxu1 %v300_v5  ;;  %v15_v32 = vld [vmem:[%s504_s0 + $0x20] sm:$0xff]  ;;  %v16_v34 = vld [vmem:[%s504_s0 + $0x28] sm:$0xff]  ;;  %v17_v36 = vld [vmem:[%s504_s0 + $0x30] sm:$0xff] }
   0xa   :  { %305 = vmatprep.subr.bf16.mxu0 %v304_v8  ;;  %330 = vmatprep.subr.bf16.mxu1 %v304_v8  ;;  %v23_v33 = vld [vmem:[%s504_s0 + $0x60] sm:$0xff]  ;;  %v24_v35 = vld [vmem:[%s504_s0 + $0x68] sm:$0xff]  ;;  %v25_v37 = vld [vmem:[%s504_s0 + $0x70] sm:$0xff] }
   0xb   :  { %v18_v38 = vld [vmem:[%s504_s0 + $0x38] sm:$0xff] }
   0xc   :  { %v26_v39 = vld [vmem:[%s504_s0 + $0x78] sm:$0xff] }
   0xd   :  { %307 = vmatpush3.bf16.msra.mxu0 %v304_v8  ;;  %338 = vmatpush3.bf16.msra.mxu1 %v304_v8 }
   0xe   :  { %309 = vmatprep.subr.bf16.mxu0 %v308_v13  ;;  %331 = vmatprep.subr.bf16.mxu1 %v308_v13 }
  0x11   :  { %311 = vmatpush3.bf16.msra.mxu0 %v308_v13  ;;  %339 = vmatpush3.bf16.msra.mxu1 %v308_v13 }
  0x12   :  { %313 = vmatprep.subr.bf16.mxu0 %v312_v16  ;;  %332 = vmatprep.subr.bf16.mxu1 %v312_v16 }
  0x15   :  { %315 = vmatpush3.bf16.msra.mxu0 %v312_v16  ;;  %340 = vmatpush3.bf16.msra.mxu1 %v312_v16 }
  0x16   :  { %317 = vmatprep.subr.bf16.mxu0 %v316_v19  ;;  %333 = vmatprep.subr.bf16.mxu1 %v316_v19 }
  0x19   :  { %319 = vmatpush3.bf16.msra.mxu0 %v316_v19  ;;  %341 = vmatpush3.bf16.msra.mxu1 %v316_v19 }
  0x1a   :  { %321 = vmatprep.subr.bf16.mxu0 %v320_v22  ;;  %334 = vmatprep.subr.bf16.mxu1 %v320_v22 }
  0x1d   :  { %323 = vmatpush3.bf16.msra.mxu0 %v320_v22  ;;  %342 = vmatpush3.bf16.msra.mxu1 %v320_v22 }
  0x1e   :  { %325 = vmatprep.subr.bf16.mxu0 %v324_v25  ;;  %335 = vmatprep.subr.bf16.mxu1 %v324_v25 }
  0x21   :  { %327 = vmatpush3.bf16.msra.mxu0 %v324_v25  ;;  %343 = vmatpush3.bf16.msra.mxu1 %v324_v25 }
  0x24   :  { %273 = vmatmul.mubr.f32.vlgmr.msra.gmra.mrb[0].mxu0 %v12_v26  ;;  %285 = vmatmul.mubr.f32.vlgmr.msra.gmra.mrb[0].mxu1 %v20_v27 }
  0x25   :  { %275 = vmatprep.mubr.f32.mxu0 %v13_v28  ;;  %287 = vmatprep.mubr.f32.mxu1 %v21_v29 }
  0x28   :  { %276 = vmatmul.mubr.f32.gmra.mrb[2].mxu0 %v14_v30  ;;  %288 = vmatmul.mubr.f32.gmra.mrb[2].mxu1 %v22_v31 }
  0x29   :  { %278 = vmatprep.mubr.f32.mxu0 %v15_v32  ;;  %290 = vmatprep.mubr.f32.mxu1 %v23_v33 }
  0x2c   :  { %279 = vmatmul.mubr.f32.gmra.mrb[4].mxu0 %v16_v34  ;;  %291 = vmatmul.mubr.f32.gmra.mrb[4].mxu1 %v24_v35 }
  0x2d   :  { %281 = vmatprep.mubr.f32.mxu0 %v17_v36  ;;  %293 = vmatprep.mubr.f32.mxu1 %v25_v37 }
  0x30   :  { %282 = vmatmul.mubr.f32.gmra.mrb[6].mxu0 %v18_v38  ;;  %294 = vmatmul.mubr.f32.gmra.mrb[6].mxu1 %v26_v39 }
  0xf7   :  { %v274_v40 = vpop.f32.mrb[0].mxu0  ;;  %v286_v41 = vpop.f32.mrb[0].mxu1 }
  0xf8   :  { %189 = vst [vmem:[%s505_s2 + $0x8] sm:$0xff] %v274_v40  ;;  %197 = vst [vmem:[%s505_s2 + $0x48] sm:$0xff] %v286_v41  ;;  %v109_v42 = vpop.f32.mrb[1].mxu0  ;;  %v149_v43 = vpop.f32.mrb[1].mxu1 }
  0xf9   :  { %188 = vst [vmem:[%s505_s2] sm:$0xff] %v109_v42  ;;  %196 = vst [vmem:[%s505_s2 + $0x40] sm:$0xff] %v149_v43 }
  0xfb   :  { %v277_v44 = vpop.f32.mrb[2].mxu0  ;;  %v289_v45 = vpop.f32.mrb[2].mxu1 }
  0xfc   :  { %191 = vst [vmem:[%s505_s2 + $0x18] sm:$0xff] %v277_v44  ;;  %199 = vst [vmem:[%s505_s2 + $0x58] sm:$0xff] %v289_v45  ;;  %v119_v46 = vpop.f32.mrb[3].mxu0  ;;  %v159_v47 = vpop.f32.mrb[3].mxu1 }
  0xfd   :  { %190 = vst [vmem:[%s505_s2 + $0x10] sm:$0xff] %v119_v46  ;;  %198 = vst [vmem:[%s505_s2 + $0x50] sm:$0xff] %v159_v47 }
  0xff   :  { %v280_v48 = vpop.f32.mrb[4].mxu0  ;;  %v292_v49 = vpop.f32.mrb[4].mxu1 }
 0x100   :  { %193 = vst [vmem:[%s505_s2 + $0x28] sm:$0xff] %v280_v48  ;;  %201 = vst [vmem:[%s505_s2 + $0x68] sm:$0xff] %v292_v49  ;;  %v129_v50 = vpop.f32.mrb[5].mxu0  ;;  %v169_v51 = vpop.f32.mrb[5].mxu1 }
 0x101   :  { %192 = vst [vmem:[%s505_s2 + $0x20] sm:$0xff] %v129_v50  ;;  %200 = vst [vmem:[%s505_s2 + $0x60] sm:$0xff] %v169_v51 }
 0x103   :  { %v283_v52 = vpop.f32.mrb[6].mxu0  ;;  %v295_v53 = vpop.f32.mrb[6].mxu1 }
 0x104   :  { %195 = vst [vmem:[%s505_s2 + $0x38] sm:$0xff] %v283_v52  ;;  %203 = vst [vmem:[%s505_s2 + $0x78] sm:$0xff] %v295_v53  ;;  %v139_v54 = vpop.f32.mrb[7].mxu0  ;;  %v179_v55 = vpop.f32.mrb[7].mxu1 }
 0x105   :  { %194 = vst [vmem:[%s505_s2 + $0x30] sm:$0xff] %v139_v54  ;;  %202 = vst [vmem:[%s505_s2 + $0x70] sm:$0xff] %v179_v55 }

// kernel: gcn_layer.2
= control target key start
LH: loop header
LB: loop body
LE: loop exit
PB: predicated region body
PF: predicated region fallthrough
CT: control target
= control target key end

     0   :  { %s522_s1 = inlined_call_operand.vmem [shape: f32[128,128], index: 1, kind: input, shape index: {}]   ;;  %s523_s0 = inlined_call_operand.vmem [shape: f32[128,128], index: 0, kind: input, shape index: {}]   ;;  %s524_s2 = inlined_call_operand.vmem [shape: f32[1,128], index: 2, kind: input, shape index: {}]   ;;  %s525_s3 = inlined_call_operand.vmem [shape: f32[128,128], index: 3, kind: output, shape index: {}]  }
   0x1   :  { %v30_v0 = vld [vmem:[%s522_s1] sm:$0xff]  ;;  %v31_v1 = vld [vmem:[%s522_s1 + $0x8] sm:$0xff]  ;;  %v32_v2 = vld [vmem:[%s522_s1 + $0x10] sm:$0xff] }
   0x2   :  { %v307_v3 = vpack.c.bf16 %v31_v1, %v30_v0  ;;  %v33_v4 = vld [vmem:[%s522_s1 + $0x18] sm:$0xff]  ;;  %v34_v6 = vld [vmem:[%s522_s1 + $0x20] sm:$0xff]  ;;  %v35_v7 = vld [vmem:[%s522_s1 + $0x28] sm:$0xff] }
   0x3   :  { %v311_v5 = vpack.c.bf16 %v33_v4, %v32_v2  ;;  %v315_v8 = vpack.c.bf16 %v35_v7, %v34_v6  ;;  %v14_v9 = vld [vmem:[%s523_s0] sm:$0xff]  ;;  %v36_v11 = vld [vmem:[%s522_s1 + $0x30] sm:$0xff]  ;;  %v37_v12 = vld [vmem:[%s522_s1 + $0x38] sm:$0xff] }
   0x4   :  { %308 = vmatprep.subr.bf16.mxu0 %v307_v3  ;;  %339 = vmatprep.subr.bf16.mxu1 %v307_v3  ;;  %v22_v10 = vld [vmem:[%s523_s0 + $0x40] sm:$0xff]  ;;  %v319_v13 = vpack.c.bf16 %v37_v12, %v36_v11  ;;  %v39_v15 = vld [vmem:[%s522_s1 + $0x48] sm:$0xff]  ;;  %v40_v17 = vld [vmem:[%s522_s1 + $0x50] sm:$0xff] }
   0x5   :  { %310 = vmatpush3.bf16.msra.mxu0 %v307_v3  ;;  %347 = vmatpush3.bf16.msra.mxu1 %v307_v3  ;;  %v38_v14 = vld [vmem:[%s522_s1 + $0x40] sm:$0xff]  ;;  %v41_v18 = vld [vmem:[%s522_s1 + $0x58] sm:$0xff]  ;;  %v43_v21 = vld [vmem:[%s522_s1 + $0x68] sm:$0xff] }
   0x6   :  { %312 = vmatprep.subr.bf16.mxu0 %v311_v5  ;;  %340 = vmatprep.subr.bf16.mxu1 %v311_v5  ;;  %v323_v16 = vpack.c.bf16 %v39_v15, %v38_v14  ;;  %v327_v19 = vpack.c.bf16 %v41_v18, %v40_v17  ;;  %v42_v20 = vld [vmem:[%s522_s1 + $0x60] sm:$0xff]  ;;  %v44_v23 = vld [vmem:[%s522_s1 + $0x70] sm:$0xff]  ;;  %v45_v24 = vld [vmem:[%s522_s1 + $0x78] sm:$0xff] }
   0x7   :  { %283 = vmatprep.mubr.f32.mxu0 %v14_v9  ;;  %295 = vmatprep.mubr.f32.mxu1 %v22_v10  ;;  %v331_v22 = vpack.c.bf16 %v43_v21, %v42_v20  ;;  %v335_v25 = vpack.c.bf16 %v45_v24, %v44_v23  ;;  %v15_v26 = vld [vmem:[%s523_s0 + $0x8] sm:$0xff]  ;;  %v16_v28 = vld [vmem:[%s523_s0 + $0x10] sm:$0xff]  ;;  %v17_v30 = vld [vmem:[%s523_s0 + $0x18] sm:$0xff] }
   0x8   :  { %v23_v27 = vld [vmem:[%s523_s0 + $0x48] sm:$0xff]  ;;  %v24_v29 = vld [vmem:[%s523_s0 + $0x50] sm:$0xff]  ;;  %v25_v31 = vld [vmem:[%s523_s0 + $0x58] sm:$0xff] }
   0x9   :  { %314 = vmatpush3.bf16.msra.mxu0 %v311_v5  ;;  %348 = vmatpush3.bf16.msra.mxu1 %v311_v5  ;;  %v18_v32 = vld [vmem:[%s523_s0 + $0x20] sm:$0xff]  ;;  %v19_v34 = vld [vmem:[%s523_s0 + $0x28] sm:$0xff]  ;;  %v20_v36 = vld [vmem:[%s523_s0 + $0x30] sm:$0xff] }
   0xa   :  { %316 = vmatprep.subr.bf16.mxu0 %v315_v8  ;;  %341 = vmatprep.subr.bf16.mxu1 %v315_v8  ;;  %v26_v33 = vld [vmem:[%s523_s0 + $0x60] sm:$0xff]  ;;  %v27_v35 = vld [vmem:[%s523_s0 + $0x68] sm:$0xff]  ;;  %v28_v37 = vld [vmem:[%s523_s0 + $0x70] sm:$0xff] }
   0xb   :  { %v21_v38 = vld [vmem:[%s523_s0 + $0x38] sm:$0xff]  ;;  %v218_v40 = vld [vmem:[%s524_s2] ss:$0 sm:$0xff] }
   0xc   :  { %v29_v39 = vld [vmem:[%s523_s0 + $0x78] sm:$0xff] }
   0xd   :  { %318 = vmatpush3.bf16.msra.mxu0 %v315_v8  ;;  %349 = vmatpush3.bf16.msra.mxu1 %v315_v8 }
   0xe   :  { %320 = vmatprep.subr.bf16.mxu0 %v319_v13  ;;  %342 = vmatprep.subr.bf16.mxu1 %v319_v13 }
  0x11   :  { %322 = vmatpush3.bf16.msra.mxu0 %v319_v13  ;;  %350 = vmatpush3.bf16.msra.mxu1 %v319_v13 }
  0x12   :  { %324 = vmatprep.subr.bf16.mxu0 %v323_v16  ;;  %343 = vmatprep.subr.bf16.mxu1 %v323_v16 }
  0x15   :  { %326 = vmatpush3.bf16.msra.mxu0 %v323_v16  ;;  %351 = vmatpush3.bf16.msra.mxu1 %v323_v16 }
  0x16   :  { %328 = vmatprep.subr.bf16.mxu0 %v327_v19  ;;  %344 = vmatprep.subr.bf16.mxu1 %v327_v19 }
  0x19   :  { %330 = vmatpush3.bf16.msra.mxu0 %v327_v19  ;;  %352 = vmatpush3.bf16.msra.mxu1 %v327_v19 }
  0x1a   :  { %332 = vmatprep.subr.bf16.mxu0 %v331_v22  ;;  %345 = vmatprep.subr.bf16.mxu1 %v331_v22 }
  0x1d   :  { %334 = vmatpush3.bf16.msra.mxu0 %v331_v22  ;;  %353 = vmatpush3.bf16.msra.mxu1 %v331_v22 }
  0x1e   :  { %336 = vmatprep.subr.bf16.mxu0 %v335_v25  ;;  %346 = vmatprep.subr.bf16.mxu1 %v335_v25 }
  0x21   :  { %338 = vmatpush3.bf16.msra.mxu0 %v335_v25  ;;  %354 = vmatpush3.bf16.msra.mxu1 %v335_v25 }
  0x24   :  { %284 = vmatmul.mubr.f32.vlgmr.msra.gmra.mrb[0].mxu0 %v15_v26  ;;  %296 = vmatmul.mubr.f32.vlgmr.msra.gmra.mrb[0].mxu1 %v23_v27 }
  0x25   :  { %286 = vmatprep.mubr.f32.mxu0 %v16_v28  ;;  %298 = vmatprep.mubr.f32.mxu1 %v24_v29 }
  0x28   :  { %287 = vmatmul.mubr.f32.gmra.mrb[2].mxu0 %v17_v30  ;;  %299 = vmatmul.mubr.f32.gmra.mrb[2].mxu1 %v25_v31 }
  0x29   :  { %289 = vmatprep.mubr.f32.mxu0 %v18_v32  ;;  %301 = vmatprep.mubr.f32.mxu1 %v26_v33 }
  0x2c   :  { %290 = vmatmul.mubr.f32.gmra.mrb[4].mxu0 %v19_v34  ;;  %302 = vmatmul.mubr.f32.gmra.mrb[4].mxu1 %v27_v35 }
  0x2d   :  { %292 = vmatprep.mubr.f32.mxu0 %v20_v36  ;;  %304 = vmatprep.mubr.f32.mxu1 %v28_v37 }
  0x30   :  { %293 = vmatmul.mubr.f32.gmra.mrb[6].mxu0 %v21_v38  ;;  %305 = vmatmul.mubr.f32.gmra.mrb[6].mxu1 %v29_v39 }
  0xf7   :  { %v285_v41 = vpop.f32.mrb[0].mxu0  ;;  %v297_v42 = vpop.f32.mrb[0].mxu1 }
  0xf8   :  { %v125_v43 = vadd.f32 %v285_v41, %v218_v40  ;;  %v165_v44 = vadd.f32 %v297_v42, %v218_v40  ;;  %v119_v45 = vpop.f32.mrb[1].mxu0  ;;  %v159_v46 = vpop.f32.mrb[1].mxu1 }
  0xf9   :  { %v120_v47 = vadd.f32 %v218_v40, %v119_v45  ;;  %v160_v48 = vadd.f32 %v218_v40, %v159_v46 }
  0xfa   :  { %199 = vst [vmem:[%s525_s3 + $0x8] sm:$0xff] %v125_v43  ;;  %207 = vst [vmem:[%s525_s3 + $0x48] sm:$0xff] %v165_v44 }
  0xfb   :  { %198 = vst [vmem:[%s525_s3] sm:$0xff] %v120_v47  ;;  %206 = vst [vmem:[%s525_s3 + $0x40] sm:$0xff] %v160_v48  ;;  %v288_v49 = vpop.f32.mrb[2].mxu0  ;;  %v300_v50 = vpop.f32.mrb[2].mxu1 }
  0xfc   :  { %v135_v51 = vadd.f32 %v288_v49, %v218_v40  ;;  %v175_v52 = vadd.f32 %v300_v50, %v218_v40  ;;  %v129_v53 = vpop.f32.mrb[3].mxu0  ;;  %v169_v54 = vpop.f32.mrb[3].mxu1 }
  0xfd   :  { %v130_v55 = vadd.f32 %v218_v40, %v129_v53  ;;  %v170_v56 = vadd.f32 %v218_v40, %v169_v54 }
  0xfe   :  { %201 = vst [vmem:[%s525_s3 + $0x18] sm:$0xff] %v135_v51  ;;  %209 = vst [vmem:[%s525_s3 + $0x58] sm:$0xff] %v175_v52 }
  0xff   :  { %200 = vst [vmem:[%s525_s3 + $0x10] sm:$0xff] %v130_v55  ;;  %208 = vst [vmem:[%s525_s3 + $0x50] sm:$0xff] %v170_v56  ;;  %v291_v57 = vpop.f32.mrb[4].mxu0  ;;  %v303_v58 = vpop.f32.mrb[4].mxu1 }
 0x100   :  { %v145_v59 = vadd.f32 %v291_v57, %v218_v40  ;;  %v185_v60 = vadd.f32 %v303_v58, %v218_v40  ;;  %v139_v61 = vpop.f32.mrb[5].mxu0  ;;  %v179_v62 = vpop.f32.mrb[5].mxu1 }
 0x101   :  { %v140_v63 = vadd.f32 %v218_v40, %v139_v61  ;;  %v180_v0 = vadd.f32 %v218_v40, %v179_v62 }
 0x102   :  { %203 = vst [vmem:[%s525_s3 + $0x28] sm:$0xff] %v145_v59  ;;  %211 = vst [vmem:[%s525_s3 + $0x68] sm:$0xff] %v185_v60 }
 0x103   :  { %202 = vst [vmem:[%s525_s3 + $0x20] sm:$0xff] %v140_v63  ;;  %210 = vst [vmem:[%s525_s3 + $0x60] sm:$0xff] %v180_v0  ;;  %v294_v1 = vpop.f32.mrb[6].mxu0  ;;  %v306_v2 = vpop.f32.mrb[6].mxu1 }
 0x104   :  { %v155_v3 = vadd.f32 %v294_v1, %v218_v40  ;;  %v195_v4 = vadd.f32 %v306_v2, %v218_v40  ;;  %v149_v5 = vpop.f32.mrb[7].mxu0  ;;  %v189_v6 = vpop.f32.mrb[7].mxu1 }
 0x105   :  { %v150_v7 = vadd.f32 %v218_v40, %v149_v5  ;;  %v190_v8 = vadd.f32 %v218_v40, %v189_v6 }
 0x106   :  { %205 = vst [vmem:[%s525_s3 + $0x38] sm:$0xff] %v155_v3  ;;  %213 = vst [vmem:[%s525_s3 + $0x78] sm:$0xff] %v195_v4 }
 0x107   :  { %204 = vst [vmem:[%s525_s3 + $0x30] sm:$0xff] %v150_v7  ;;  %212 = vst [vmem:[%s525_s3 + $0x70] sm:$0xff] %v190_v8 }

</bundles_post_ra>
